<compile_context>
chip_gen: v5e
topology: v5e:2x2
jax: 0.10.0
libtpu: 0.0.40
codegen_flags: <defaults>
</compile_context>

<pallas_src>
import functools

import jax
import jax.numpy as jnp
from jax.experimental import pallas as pl
from jax.experimental.pallas import tpu as pltpu


def _categorical_kernel(logp_ref, u_ref, out_ref, *, num_classes):
    k = num_classes

    # Log-weights for this batch tile, promoted to f32 (accepts bf16 inputs).
    lp = logp_ref[...].astype(jnp.float32)                       # (TB, K)

    # Row-max subtraction: keeps exp() finite for unnormalized log_p and
    # guarantees the per-row total is >= 1 (no all-zero degenerate rows).
    m = jnp.max(lp, axis=-1, keepdims=True)                      # (TB, 1)
    p = jnp.exp(lp - m)                                          # (TB, K)

    # Cumulative sum along the category axis via the MXU:
    #   csum[i, j] = sum_{c <= j} p[i, c]  =  (p @ tri)[i, j]
    # where tri[c, j] = 1 if c <= j.  Avoids a sequential lane-axis scan.
    row = jax.lax.broadcasted_iota(jnp.int32, (k, k), 0)
    col = jax.lax.broadcasted_iota(jnp.int32, (k, k), 1)
    tri = (row <= col).astype(jnp.float32)                       # (K, K)
    csum = jnp.dot(p, tri, preferred_element_type=jnp.float32)   # (TB, K)
    total = csum[:, -1:]                                         # (TB, 1)

    # Inverse-CDF: sampled index = #buckets whose cumulative mass <= u*total.
    thresh = u_ref[...] * total                                  # (TB, 1)
    idx_f = jnp.sum((csum <= thresh).astype(jnp.float32), axis=-1,
                    keepdims=True)                               # (TB, 1)
    idx = idx_f.astype(jnp.int32)

    # u*total can round up to == total in f32 -> idx == K; clamp to K-1.
    out_ref[...] = jnp.minimum(idx, k - 1)


def categorical_sample(log_p, key):
    """Pallas equivalent of Categorical().forward(log_p).

    Args:
      log_p: (B, K) float array of (possibly unnormalized) log-probabilities.
      key:   jax.random PRNG key used for the per-row uniform draws.
    Returns:
      (B,) int32 array of sampled class indices.
    """
    B, K = log_p.shape

    # One uniform per row.  Drawn outside the kernel (the TPU hardware PRNG
    # has no CPU/interpret lowering); only 4*B bytes of extra HBM traffic.
    u = jax.random.uniform(key, (B, 1), dtype=jnp.float32)

    # Batch-axis tile: <= ~2 MiB of log_p per block, rows a multiple of 8
    # (or the whole batch if it is small).  Double-buffered by the Pallas
    # pipeline this stays far under v7x's 64 MiB VMEM while giving
    # DMA/compute overlap on all generations.
    bytes_per_row = K * log_p.dtype.itemsize
    tb = (2 * 1024 * 1024) // max(1, bytes_per_row)
    tb = min(B, max(8, (tb // 8) * 8))
    grid = (pl.cdiv(B, tb),)

    kernel = functools.partial(_categorical_kernel, num_classes=K)
    out = pl.pallas_call(
        kernel,
        out_shape=jax.ShapeDtypeStruct((B, 1), jnp.int32),
        grid=grid,
        in_specs=[
            pl.BlockSpec((tb, K), lambda i: (i, 0)),   # log_p tile
            pl.BlockSpec((tb, 1), lambda i: (i, 0)),   # per-row uniforms
        ],
        out_specs=pl.BlockSpec((tb, 1), lambda i: (i, 0)),
        compiler_params=pltpu.CompilerParams(
            dimension_semantics=("parallel",)),
        cost_estimate=pl.CostEstimate(
            flops=2 * B * K * K + 4 * B * K,
            transcendentals=B * K,
            bytes_accessed=B * K * log_p.dtype.itemsize + 8 * B),
    )(log_p, u)

    # .squeeze(1) of the torch module.
    # TODO(synk): torch returns int64; JAX's default (no x64) keeps int32.
    return out[:, 0]


if __name__ == "__main__":
    key = jax.random.PRNGKey(0)
    k_logits, k_sample = jax.random.split(key)

    B, K = 8, 128
    logits = jax.random.normal(k_logits, (B, K), dtype=jnp.float32)
    log_p = jax.nn.log_softmax(logits, axis=-1)

    samples = categorical_sample(log_p, k_sample)
    samples = jax.block_until_ready(samples)

    assert samples.shape == (B,)
    assert samples.dtype == jnp.int32
    assert bool(jnp.all((samples >= 0) & (samples < K)))
    print("KERNEL_OK")
</pallas_src>

<mosaic_0001>
module attributes {stable_mosaic.version = 11 : i64} {
  func.func @_categorical_kernel(%arg0: i32, %arg1: memref<8x128xf32, #tpu.memory_space<vmem>>, %arg2: memref<8x1xf32, #tpu.memory_space<vmem>>, %arg3: memref<8x1xi32, #tpu.memory_space<vmem>>) attributes {dimension_semantics = [#tpu.dimension_semantics<parallel>], iteration_bounds = array<i64: 1>, scalar_prefetch = 0 : i64, scratch_operands = 0 : i64, tpu.core_type = #tpu.core_type<tc>, window_params = [{transform_indices = @transform_0, window_bounds = array<i64: 8, 128>}, {transform_indices = @transform_1, window_bounds = array<i64: 8, 1>}, {transform_indices = @transform_2, window_bounds = array<i64: 8, 1>}]} {
    %c0 = arith.constant 0 : index
    %c0_0 = arith.constant 0 : index
    %0 = vector.load %arg1[%c0, %c0_0] : memref<8x128xf32, #tpu.memory_space<vmem>>, vector<8x128xf32>
    %cst = arith.constant dense<0xFF800000> : vector<8xf32>
    %1 = vector.multi_reduction <maximumf>, %0, %cst [1] : vector<8x128xf32> to vector<8xf32>
    %2 = vector.shape_cast %1 : vector<8xf32> to vector<8x1xf32>
    %3 = vector.broadcast %2 : vector<8x1xf32> to vector<8x128xf32>
    %4 = arith.subf %0, %3 : vector<8x128xf32>
    %5 = math.exp %4 : vector<8x128xf32>
    %6 = tpu.iota {dimensions = array<i32: 0>} : vector<128x128xi32>
    %7 = tpu.iota {dimensions = array<i32: 1>} : vector<128x128xi32>
    %8 = arith.cmpi sle, %6, %7 : vector<128x128xi32>
    %9 = arith.extui %8 : vector<128x128xi1> to vector<128x128xi32>
    %10 = arith.sitofp %9 : vector<128x128xi32> to vector<128x128xf32>
    %cst_1 = arith.constant dense<0.000000e+00> : vector<8x128xf32>
    %11 = tpu.matmul %5, %10, %cst_1 {dimension_numbers = #tpu.dot_dimension_numbers<[1], [0], [0], [1], [0, 0, 1, 1], [], []>} : vector<8x128xf32>, vector<128x128xf32>, vector<8x128xf32> -> vector<8x128xf32>
    %12 = vector.extract_strided_slice %11 {offsets = [0, 127], sizes = [8, 1], strides = [1, 1]} : vector<8x128xf32> to vector<8x1xf32>
    %c0_2 = arith.constant 0 : index
    %c0_3 = arith.constant 0 : index
    %13 = vector.load %arg2[%c0_2, %c0_3] : memref<8x1xf32, #tpu.memory_space<vmem>>, vector<8x1xf32>
    %14 = arith.mulf %13, %12 : vector<8x1xf32>
    %15 = vector.broadcast %14 : vector<8x1xf32> to vector<8x128xf32>
    %16 = arith.cmpf ole, %11, %15 : vector<8x128xf32>
    %17 = arith.extui %16 : vector<8x128xi1> to vector<8x128xi32>
    %18 = arith.sitofp %17 : vector<8x128xi32> to vector<8x128xf32>
    %cst_4 = arith.constant dense<0.000000e+00> : vector<8xf32>
    %19 = vector.multi_reduction <add>, %18, %cst_4 [1] : vector<8x128xf32> to vector<8xf32>
    %20 = vector.shape_cast %19 : vector<8xf32> to vector<8x1xf32>
    %21 = arith.fptosi %20 : vector<8x1xf32> to vector<8x1xi32>
    %c127_i32 = arith.constant 127 : i32
    %22 = vector.broadcast %c127_i32 : i32 to vector<8x1xi32>
    %23 = arith.minsi %21, %22 : vector<8x1xi32>
    %c0_5 = arith.constant 0 : index
    %c0_6 = arith.constant 0 : index
    %24 = vector.load %arg3[%c0_5, %c0_6] : memref<8x1xi32, #tpu.memory_space<vmem>>, vector<8x1xi32>
    tpu.vector_store %arg3[%c0_5, %c0_6], %23 {strides = array<i32>} : memref<8x1xi32, #tpu.memory_space<vmem>>, vector<8x1xi32>,
    return
  }
  func.func @transform_0(%arg0: i32) -> (i32, i32) {
    %c0_i32 = arith.constant 0 : i32
    %c0_i32_0 = arith.constant 0 : i32
    return %arg0, %c0_i32 : i32, i32
  }
  func.func @transform_1(%arg0: i32) -> (i32, i32) {
    %c0_i32 = arith.constant 0 : i32
    %c0_i32_0 = arith.constant 0 : i32
    return %arg0, %c0_i32 : i32, i32
  }
  func.func @transform_2(%arg0: i32) -> (i32, i32) {
    %c0_i32 = arith.constant 0 : i32
    %c0_i32_0 = arith.constant 0 : i32
    return %arg0, %c0_i32 : i32, i32
  }
}

</mosaic_0001>

<bundles_post_ra>
// kernel: tpu_custom_call.1
= control target key start
LH: loop header
LB: loop body
LE: loop exit
PB: predicated region body
PF: predicated region fallthrough
CT: control target
= control target key end

     0   :  { %v17_v0 = vlaneseq  ;;  %v175_v8 = vmov 1.0   ;;  %v177_v25 = vmov 0   ;;  %v178_v30 = vmov 0.0   ;;  %s203_s0 = inlined_call_operand.vmem [shape: f32[8,128], index: 0, kind: input, shape index: {}]   ;;  %s204_s1 = inlined_call_operand.vmem [shape: f32[8,1], index: 1, kind: input, shape index: {}]   ;;  %s205_s2 = inlined_call_operand.vmem [shape: s32[8,1], index: 2, kind: output, shape index: {}]  }
   0x1   :  { %v11_v1 = vld [vmem:[%s203_s0] sm:$0xff]  ;;  %s176_s0 = smov 1   ;;  %171 = vset.pattern.permute.xlu1 %v177_v25  ;;  %172 = vset.pattern.permute.xlu0 %v177_v25 }
   0x2   :  { %12 = vmax.xlane.f32.xlu0 %v11_v1  ;;  %v18_v2 = vshrl.u32 %v17_v0, 7  ;;  %v35_v3 = vand.u32 127, %v17_v0  ;;  %v104_v26 = vld [vmem:[%s204_s1] sm:$0xff] }
   0x4   :  { %v33_v4 = vadd.s32 120, %v18_v2  ;;  %v32_v5 = vadd.s32 112, %v18_v2  ;;  %v31_v6 = vadd.s32 104, %v18_v2  ;;  %v30_v7 = vadd.s32 96, %v18_v2 }
   0x5   :  { %v29_v9 = vadd.s32 88, %v18_v2  ;;  %v28_v10 = vadd.s32 80, %v18_v2  ;;  %v27_v11 = vadd.s32 72, %v18_v2  ;;  %v26_v12 = vadd.s32 64, %v18_v2 }
   0x6   :  { %vm51_vm0 = vcmp.le.s32.totalorder %v33_v4, %v35_v3  ;;  %vm50_vm1 = vcmp.le.s32.totalorder %v32_v5, %v35_v3  ;;  %vm49_vm2 = vcmp.le.s32.totalorder %v31_v6, %v35_v3  ;;  %vm48_vm3 = vcmp.le.s32.totalorder %v30_v7, %v35_v3 }
   0x7   :  { %145 = vmatpush.msk.msra.mxu0 %vm51_vm0, %v175_v8  ;;  %vm47_vm4 = vcmp.le.s32.totalorder %v29_v9, %v35_v3  ;;  %vm46_vm5 = vcmp.le.s32.totalorder %v28_v10, %v35_v3  ;;  %vm45_vm6 = vcmp.le.s32.totalorder %v27_v11, %v35_v3  ;;  %v25_v13 = vadd.s32 56, %v18_v2 }
   0x8   :  { %vm44_vm7 = vcmp.le.s32.totalorder %v26_v12, %v35_v3  ;;  %v24_v14 = vadd.s32 48, %v18_v2  ;;  %v23_v15 = vadd.s32 40, %v18_v2  ;;  %v22_v16 = vadd.s32 32, %v18_v2 }
   0x9   :  { %146 = vmatpush.msk.msra.mxu0 %vm50_vm1, %v175_v8  ;;  %vm43_vm8 = vcmp.le.s32.totalorder %v25_v13, %v35_v3  ;;  %v21_v17 = vadd.s32 24, %v18_v2  ;;  %v20_v18 = vadd.s32 16, %v18_v2  ;;  %v19_v19 = vadd.s32 8, %v18_v2 }
   0xa   :  { %vm42_vm9 = vcmp.le.s32.totalorder %v24_v14, %v35_v3  ;;  %vm41_vm10 = vcmp.le.s32.totalorder %v23_v15, %v35_v3  ;;  %vm40_vm11 = vcmp.le.s32.totalorder %v22_v16, %v35_v3  ;;  %vm36_vm15 = vcmp.le.s32.totalorder %v18_v2, %v35_v3 }
   0xb   :  { %147 = vmatpush.msk.msra.mxu0 %vm49_vm2, %v175_v8  ;;  %vm39_vm12 = vcmp.le.s32.totalorder %v21_v17, %v35_v3  ;;  %vm38_vm13 = vcmp.le.s32.totalorder %v20_v18, %v35_v3  ;;  %vm37_vm14 = vcmp.le.s32.totalorder %v19_v19, %v35_v3  ;;  %vm123_vm2 = vcmask 7168  }
   0xd   :  { %148 = vmatpush.msk.msra.mxu0 %vm48_vm3, %v175_v8 }
   0xf   :  { %149 = vmatpush.msk.msra.mxu0 %vm47_vm4, %v175_v8 }
  0x11   :  { %150 = vmatpush.msk.msra.mxu0 %vm46_vm5, %v175_v8 }
  0x13   :  { %151 = vmatpush.msk.msra.mxu0 %vm45_vm6, %v175_v8 }
  0x15   :  { %152 = vmatpush.msk.msra.mxu0 %vm44_vm7, %v175_v8 }
  0x17   :  { %153 = vmatpush.msk.msra.mxu0 %vm43_vm8, %v175_v8 }
  0x19   :  { %154 = vmatpush.msk.msra.mxu0 %vm42_vm9, %v175_v8 }
  0x1b   :  { %155 = vmatpush.msk.msra.mxu0 %vm41_vm10, %v175_v8 }
  0x1d   :  { %156 = vmatpush.msk.msra.mxu0 %vm40_vm11, %v175_v8 }
  0x1f   :  { %157 = vmatpush.msk.msra.mxu0 %vm39_vm12, %v175_v8 }
  0x21   :  { %158 = vmatpush.msk.msra.mxu0 %vm38_vm13, %v175_v8 }
  0x23   :  { %159 = vmatpush.msk.msra.mxu0 %vm37_vm14, %v175_v8 }
  0x25   :  { %160 = vmatpush.msk.msra.mxu0 %vm36_vm15, %v175_v8 }
  0x75   :  { %v13_v20 = vpop.xlane.xlu0 %12 }
  0x76   :  { %v14_v21 = vsub.f32 %v11_v1, %v13_v20 }
  0x78   :  { %v15_v22 = vmul.f32 1.442695, %v14_v21 }
  0x7a   :  { %173 = vpow2.f32 %v15_v22 }
  0x80   :  { %v174_v23 = vpop.eup %173 }
  0x81   :  { %100 = vmatmul.f32.vlgmr.msra.gmra.mxu0 %v174_v23 }
  0xfe   :  { %v101_v24 = vpop.f32.mrf.mxu0 }
  0xff   :  { %106 = vrot.lane.b32.xlu0 %v101_v24, %s176_s0 }
 0x171   :  { %v107_v27 = vpop.permute.xlu0 %106 }
 0x172   :  { %v109_v28 = vmul.f32 %v107_v27, %v104_v26 }
 0x174   :  { %112 = vperm.xlu1 %171, %v109_v28  }
 0x1e6   :  { %v113_v29 = vpop.permute.xlu1 %112 }
 0x1e7   :  { %vm115_vm0 = vcmp.le.f32.partialorder %v101_v24, %v113_v29 }
 0x1e8   :  { %v161_v31 = vsel %vm115_vm0, 1.0, %v178_v30 }
 0x1e9   :  { %118 = vadd.xlane.f32.xlu1 %v161_v31 }
 0x25c   :  { %v119_v32 = vpop.xlane.xlu1 %118 }
 0x25d   :  { %vm162_vm1 = vcmp.lt.s32.totalorder %v119_v32, 0  ;;  %v163_v33 = vceil.f32 %v119_v32  ;;  %v164_v34 = vfloor.f32 %v119_v32 }
 0x25f   :  { %v165_v35 = vsel %vm162_vm1, %v163_v33, %v164_v34 }
 0x260   :  { %v166_v36 = vcvt.f32.s32 %v165_v35 }
 0x262   :  { %vm121_vm3 = vcmp.lt.s32.totalorder %v166_v36, 127 }
 0x263   :  { %v122_v37 = vsel %vm121_vm3, %v166_v36, 127 }
 0x264   :  { %124 = vst.msk [vmem:[%s205_s2] sm:$0xff] %vm123_vm2, %v122_v37 }

</bundles_post_ra>
